<compile_context>
chip_gen: v5e
topology: v5e:2x2
jax: 0.10.0
libtpu: 0.0.40
codegen_flags: <defaults>
</compile_context>

<pallas_src>
import math

import jax
import jax.numpy as jnp
from jax.experimental import pallas as pl
from jax.experimental.pallas import tpu as pltpu


def _tower_class_kernel(x_ref, w_ref, b_ref, o_ref):
    # x_ref: (TB, D) VMEM, w_ref: (1, D) VMEM (resident across grid),
    # b_ref: (1,) SMEM scalar, o_ref: (1, TB) VMEM (lane-dense output block).
    x = x_ref[...].astype(jnp.float32)
    w = w_ref[...].astype(jnp.float32)           # (1, D) broadcasts over (TB, D)
    y = jnp.sum(x * w, axis=-1)                  # VPU mul + XLU lane reduce -> (TB,)
    y = jax.nn.sigmoid(y + b_ref[0])             # scalar bias from SMEM; sigmoid on EUP/VPU
    o_ref[...] = jnp.expand_dims(y, 0).astype(o_ref.dtype)   # dense (1, TB) store


def _round_up(n, m):
    return -(-n // m) * m


def _vmem_budgets():
    """Returns (pipeline byte budget for double-buffered tiles, vmem_limit_bytes)."""
    cap = 64 << 20  # conservative default: v7x per-TensorCore VMEM
    try:
        info = pltpu.get_tpu_info()
        for name in ("vmem_capacity_bytes", "vmem_bytes", "vmem_size_bytes"):
            v = getattr(info, name, None)
            if v:
                cap = int(v)
                break
    except Exception:
        pass
    if cap >= (100 << 20):       # v5e / v6e: 128 MiB physical VMEM
        return 72 << 20, 96 << 20
    # v7x (64 MiB per TC) or unknown generation: stay well clear of the limit.
    return 40 << 20, 48 << 20


def _auto_tile_rows(b_rows, d_model, itemsize, pipeline_budget):
    """Largest multiple-of-128 row tile whose double-buffered, lane-padded
    pipelined footprint (x blocks + (1, TB) output blocks) fits the budget."""
    lanes = _round_up(d_model, 128)               # VMEM lane padding of the x block
    per_row = 2 * lanes * itemsize + 2 * 32       # 2x x buffer + 2x 8-sublane-padded out
    tb = max(128, (pipeline_budget // per_row) // 128 * 128)
    b_pad = _round_up(b_rows, 128)
    tb = min(tb, b_pad)
    # Keep >= 2 grid steps for bigger batches so the "parallel" batch axis can
    # split across v7x's two TensorCores (no-op on single-TC v5e/v6e).
    if b_pad >= 256 and tb >= b_pad:
        tb = _round_up(b_pad // 2, 128)
    return tb


def tower_class_forward(x, w, b, *, tile_rows=None):
    """Pallas equivalent of TowerClass.forward.

    x: (B, D) input rows
    w: torch Linear.weight, shape (1, D) (any of (1,D)/(D,1)/(D,) accepted)
    b: torch Linear.bias,   shape (1,)   (any of (1,)/()/(1,1) accepted)
    returns: (B, 1), sigmoid(x @ w.T + b)
    """
    B, D = x.shape
    w2 = jnp.asarray(w).reshape(1, D)
    b1 = jnp.asarray(b).reshape(1).astype(jnp.float32)
    itemsize = jnp.dtype(x.dtype).itemsize

    pipeline_budget, vmem_limit = _vmem_budgets()
    if tile_rows is None:
        TB = _auto_tile_rows(B, D, itemsize, pipeline_budget)
    else:
        # Validate / round an explicit tile: multiple of 128, no bigger than needed.
        TB = min(max(128, _round_up(int(tile_rows), 128)), _round_up(B, 128))

    num_tiles = pl.cdiv(B, TB)
    B_out = num_tiles * TB          # lane-dense output array length (sliced below)

    out = pl.pallas_call(
        _tower_class_kernel,
        out_shape=jax.ShapeDtypeStruct((1, B_out), x.dtype),
        grid=(num_tiles,),
        in_specs=[
            pl.BlockSpec((TB, D), lambda i: (i, 0)),             # x: row-tiled (tail OOB reads padded)
            pl.BlockSpec((1, D), lambda i: (0, 0)),              # w: resident constant block
            pl.BlockSpec(memory_space=pltpu.MemorySpace.SMEM),   # bias scalar
        ],
        out_specs=pl.BlockSpec((1, TB), lambda i: (0, i)),       # lane-dense output
        compiler_params=pltpu.CompilerParams(
            dimension_semantics=("parallel",),
            vmem_limit_bytes=vmem_limit,
        ),
        cost_estimate=pl.CostEstimate(
            flops=2 * B * D,
            transcendentals=B,
            bytes_accessed=itemsize * (B * D + D + B),
        ),
    )(x, w2, b1)

    # Free row-major flatten; tail rows (if any) are discarded here.
    return out.reshape(-1)[:B].reshape(B, 1)


def init_tower_class_params(d_model, key):
    """Deterministic init mirroring nn.Linear default (uniform +/- 1/sqrt(fan_in)).

    Returns weight (1, d_model) and bias (1,) in the PyTorch layout.
    """
    kw, kb = jax.random.split(key)
    bound = 1.0 / math.sqrt(d_model)
    w = jax.random.uniform(kw, (1, d_model), jnp.float32, -bound, bound)
    b = jax.random.uniform(kb, (1,), jnp.float32, -bound, bound)
    return w, b


if __name__ == "__main__":
    key = jax.random.PRNGKey(0)
    k_x1, k_x2, k_x3, k_p = jax.random.split(key, 4)

    D = 32
    w, b = init_tower_class_params(D, k_p)

    # Case 1: tiny batch, not tile-aligned (single partial block; OOB reads discarded).
    B1 = 10
    x1 = jax.random.normal(k_x1, (B1, D), jnp.float32)
    out1 = tower_class_forward(x1, w, b)
    jax.block_until_ready(out1)
    ref1 = jax.nn.sigmoid(x1 @ w.T + b)
    assert out1.shape == (B1, 1)
    assert jnp.allclose(out1, ref1, atol=1e-5, rtol=1e-5)

    # Case 2: multi-tile grid with an explicitly requested (and rounded) tile.
    B2 = 256
    x2 = jax.random.normal(k_x2, (B2, D), jnp.float32)
    out2 = tower_class_forward(x2, w, b, tile_rows=64)   # rounded up to 128 -> 2 tiles
    jax.block_until_ready(out2)
    ref2 = jax.nn.sigmoid(x2 @ w.T + b)
    assert out2.shape == (B2, 1)
    assert jnp.allclose(out2, ref2, atol=1e-5, rtol=1e-5)

    # Case 3: ragged batch with auto-sized tiles (>= 2 grid steps, partial tail block).
    B3 = 300
    x3 = jax.random.normal(k_x3, (B3, D), jnp.float32)
    out3 = tower_class_forward(x3, w, b)
    jax.block_until_ready(out3)
    ref3 = jax.nn.sigmoid(x3 @ w.T + b)
    assert out3.shape == (B3, 1)
    assert jnp.allclose(out3, ref3, atol=1e-5, rtol=1e-5)

    print("KERNEL_OK")
</pallas_src>

<mosaic_0001>
module attributes {stable_mosaic.version = 11 : i64} {
  func.func @_tower_class_kernel(%arg0: i32, %arg1: memref<128x32xf32, #tpu.memory_space<vmem>>, %arg2: memref<1x32xf32, #tpu.memory_space<vmem>>, %arg3: memref<1xf32, #tpu.memory_space<smem>>, %arg4: memref<1x128xf32, #tpu.memory_space<vmem>>) attributes {dimension_semantics = [#tpu.dimension_semantics<parallel>], iteration_bounds = array<i64: 1>, scalar_prefetch = 0 : i64, scratch_operands = 0 : i64, tpu.core_type = #tpu.core_type<tc>, window_params = [{transform_indices = @transform_0, window_bounds = array<i64: 128, 32>}, {pipeline_mode = #tpu.pipeline_mode<synchronous>, transform_indices = @transform_1, window_bounds = array<i64: 1, 32>}, {transform_indices = @transform_2, window_bounds = array<i64: 1>}, {transform_indices = @transform_3, window_bounds = array<i64: 1, 128>}]} {
    %c0 = arith.constant 0 : index
    %c0_0 = arith.constant 0 : index
    %0 = vector.load %arg1[%c0, %c0_0] : memref<128x32xf32, #tpu.memory_space<vmem>>, vector<128x32xf32>
    %c0_1 = arith.constant 0 : index
    %c0_2 = arith.constant 0 : index
    %1 = vector.load %arg2[%c0_1, %c0_2] : memref<1x32xf32, #tpu.memory_space<vmem>>, vector<1x32xf32>
    %2 = vector.broadcast %1 : vector<1x32xf32> to vector<128x32xf32>
    %3 = arith.mulf %0, %2 : vector<128x32xf32>
    %cst = arith.constant dense<0.000000e+00> : vector<128xf32>
    %4 = vector.multi_reduction <add>, %3, %cst [1] : vector<128x32xf32> to vector<128xf32>
    %c0_3 = arith.constant 0 : index
    %5 = memref.load %arg3[%c0_3] : memref<1xf32, #tpu.memory_space<smem>>
    %6 = vector.broadcast %5 : f32 to vector<128xf32>
    %7 = arith.addf %4, %6 : vector<128xf32>
    %8 = arith.negf %7 : vector<128xf32>
    %9 = math.exp %8 : vector<128xf32>
    %cst_4 = arith.constant 1.000000e+00 : f32
    %10 = vector.broadcast %cst_4 : f32 to vector<128xf32>
    %11 = arith.addf %10, %9 : vector<128xf32>
    %12 = arith.divf %10, %11 : vector<128xf32>
    %13 = vector.shape_cast %12 : vector<128xf32> to vector<1x128xf32>
    %c0_5 = arith.constant 0 : index
    %c0_6 = arith.constant 0 : index
    %14 = vector.load %arg4[%c0_5, %c0_6] : memref<1x128xf32, #tpu.memory_space<vmem>>, vector<1x128xf32>
    tpu.vector_store %arg4[%c0_5, %c0_6], %13 {strides = array<i32>} : memref<1x128xf32, #tpu.memory_space<vmem>>, vector<1x128xf32>,
    return
  }
  func.func @transform_0(%arg0: i32) -> (i32, i32) {
    %c0_i32 = arith.constant 0 : i32
    %c0_i32_0 = arith.constant 0 : i32
    return %arg0, %c0_i32 : i32, i32
  }
  func.func @transform_1(%arg0: i32) -> (i32, i32) {
    %c0_i32 = arith.constant 0 : i32
    %c0_i32_0 = arith.constant 0 : i32
    %c0_i32_1 = arith.constant 0 : i32
    return %c0_i32, %c0_i32_0 : i32, i32
  }
  func.func @transform_2(%arg0: i32) -> i32 {
    %c0_i32 = arith.constant 0 : i32
    %c0_i32_0 = arith.constant 0 : i32
    return %c0_i32 : i32
  }
  func.func @transform_3(%arg0: i32) -> (i32, i32) {
    %c0_i32 = arith.constant 0 : i32
    %c0_i32_0 = arith.constant 0 : i32
    return %c0_i32, %arg0 : i32, i32
  }
}

</mosaic_0001>

<bundles_post_ra>
// kernel: tpu_custom_call.1
= control target key start
LH: loop header
LB: loop body
LE: loop exit
PB: predicated region body
PF: predicated region fallthrough
CT: control target
= control target key end

     0   :  { %9 = vsyncpa [#allocation4], 0  ;;  %s1237_s0 = inlined_call_operand.hbm [shape: f32[10,32], index: 0, kind: input, shape index: {}]   ;;  %s1238_s1 = inlined_call_operand.vmem [shape: f32[1,32], index: 1, kind: input, shape index: {}]   ;;  %s1239_s2 = inlined_call_operand.<no memory space> [shape: f32[1], index: 2, kind: input, shape index: {}]   ;;  %s1240_s3 = inlined_call_operand.hbm [shape: f32[1,128], index: 3, kind: output, shape index: {}]  }
   0x1   :  { %10 = vsyncpa [#allocation5], 0 }
   0x2   :  { %14 = vsyncadd [#allocation4], 1792  ;;  %s15_s14 = sshll.u32 %s1237_s0, 4  ;;  %s674_s15 = smov [#allocation3]   ;;  %s16_s14 = int_to_ptr.hbm [resolvable:$true] %s15_s14 }
   0x3   :  { %s17_s16 = sshll.u32 %s674_s15, 4  ;;  %s675_s17 = smov 128   ;;  %s18_s16 = int_to_ptr.vmem [resolvable:$true] %s17_s16 }
   0x4   :  { %s676_s18 = smov 8  }
   0x5   :  { %23 = dma.hbm_to_vmem [thread:$0]  %s16_s14, 256, %s18_s16, [#allocation4], %s675_s17, %s675_s17, %s676_s18  }
   0x6   :  { %670 = dma.done.wait [#allocation4], 2048  }
   0x7   :  { %671 = vsyncadd [#allocation4], 4294965248  ;;  %v36_v0 = vld [vmem:[#allocation3 + $0x20] sm:$0xff]  ;;  %vm68_vm0 = vcmask 261120   ;;  %v34_v2 = vld [vmem:[#allocation3 + $0x10] sm:$0xff]  ;;  %v723_v49 = vstv %s1239_s2  ;;  %s677_s2 = smov [#allocation6]  }
   0x8   :  { %v557_v1 = vld [vmem:[%s1238_s1] ss:$0 sm:$0xff]  ;;  %v37_v7 = vld [vmem:[#allocation3 + $0x28] sm:$0xff]  ;;  %v35_v8 = vld [vmem:[#allocation3 + $0x18] sm:$0xff]  ;;  %s525_s21 = sshll.u32 %s677_s2, 4  ;;  %s527_s24 = sshll.u32 %s1240_s3, 4  ;;  %s526_s21 = int_to_ptr.vmem [resolvable:$true] %s525_s21  ;;  %s528_s24 = int_to_ptr.hbm [resolvable:$true] %s527_s24 }
   0x9   :  { %v32_v3 = vld [vmem:[#allocation3] sm:$0xff]  ;;  %v56_v4 = vmul.f32 %v557_v1, %v36_v0  ;;  %v54_v5 = vmul.f32 %v557_v1, %v34_v2  ;;  %v33_v12 = vld [vmem:[#allocation3 + $0x8] sm:$0xff]  ;;  %v57_v13 = vmul.f32 %v557_v1, %v37_v7  ;;  %v55_v14 = vmul.f32 %v557_v1, %v35_v8  ;;  %v39_v20 = vld [vmem:[#allocation3 + $0x38] sm:$0xff] }
   0xa   :  { %v52_v6 = vmul.f32 %v557_v1, %v32_v3  ;;  %v53_v15 = vmul.f32 %v557_v1, %v33_v12  ;;  %v40_v19 = vld [vmem:[#allocation3 + $0x40] sm:$0xff]  ;;  %v38_v21 = vld [vmem:[#allocation3 + $0x30] sm:$0xff]  ;;  %v59_v23 = vmul.f32 %v557_v1, %v39_v20  ;;  %v43_v28 = vld [vmem:[#allocation3 + $0x58] sm:$0xff] }
   0xb   :  { %v81_v9 = vsel %vm68_vm0, %v56_v4, 0.0  ;;  %v75_v10 = vsel %vm68_vm0, %v54_v5, 0.0  ;;  %v84_v16 = vsel %vm68_vm0, %v57_v13, 0.0  ;;  %v78_v17 = vsel %vm68_vm0, %v55_v14, 0.0  ;;  %v42_v29 = vld [vmem:[#allocation3 + $0x50] sm:$0xff]  ;;  %v41_v30 = vld [vmem:[#allocation3 + $0x48] sm:$0xff] }
   0xc   :  { %v69_v11 = vsel %vm68_vm0, %v52_v6, 0.0  ;;  %82 = vadd.xlane.f32.xlu2 %v81_v9  ;;  %76 = vadd.xlane.f32.xlu1 %v75_v10  ;;  %v72_v18 = vsel %vm68_vm0, %v53_v15, 0.0  ;;  %v60_v22 = vmul.f32 %v557_v1, %v40_v19  ;;  %v58_v24 = vmul.f32 %v557_v1, %v38_v21  ;;  %v46_v37 = vld [vmem:[#allocation3 + $0x70] sm:$0xff]  ;;  %v45_v38 = vld [vmem:[#allocation3 + $0x68] sm:$0xff]  ;;  %v44_v39 = vld [vmem:[#allocation3 + $0x60] sm:$0xff] }
   0xd   :  { %70 = vadd.xlane.f32.xlu0 %v69_v11  ;;  %v90_v26 = vsel %vm68_vm0, %v59_v23, 0.0  ;;  %v63_v31 = vmul.f32 %v557_v1, %v43_v28  ;;  %v62_v32 = vmul.f32 %v557_v1, %v42_v29  ;;  %v61_v33 = vmul.f32 %v557_v1, %v41_v30  ;;  %v47_v46 = vld [vmem:[#allocation3 + $0x78] sm:$0xff] }
   0xe   :  { %v93_v25 = vsel %vm68_vm0, %v60_v22, 0.0  ;;  %v87_v27 = vsel %vm68_vm0, %v58_v24, 0.0  ;;  %v66_v40 = vmul.f32 %v557_v1, %v46_v37  ;;  %v65_v41 = vmul.f32 %v557_v1, %v45_v38 }
   0xf   :  { %v102_v34 = vsel %vm68_vm0, %v63_v31, 0.0  ;;  %v99_v35 = vsel %vm68_vm0, %v62_v32, 0.0  ;;  %v96_v36 = vsel %vm68_vm0, %v61_v33, 0.0  ;;  %v64_v42 = vmul.f32 %v557_v1, %v44_v39 }
  0x10   :  { %v111_v43 = vsel %vm68_vm0, %v66_v40, 0.0  ;;  %v108_v44 = vsel %vm68_vm0, %v65_v41, 0.0  ;;  %v67_v47 = vmul.f32 %v557_v1, %v47_v46  ;;  %v455_v9 = vlaneseq }
  0x11   :  { %v105_v45 = vsel %vm68_vm0, %v64_v42, 0.0 }
  0x12   :  { %v114_v48 = vsel %vm68_vm0, %v67_v47, 0.0  ;;  %v740_v13 = vand.u32 127, %v455_v9 }
  0x14   :  { %85 = vadd.xlane.f32.xlu2 %v84_v16  ;;  %79 = vadd.xlane.f32.xlu1 %v78_v17  ;;  %v753_v22 = vadd.s32 4294967264, %v740_v13  ;;  %v771_v31 = vadd.s32 4294967256, %v740_v13 }
  0x15   :  { %73 = vadd.xlane.f32.xlu0 %v72_v18 }
  0x1c   :  { %94 = vadd.xlane.f32.xlu2 %v93_v25  ;;  %91 = vadd.xlane.f32.xlu1 %v90_v26  ;;  %v760_v25 = vadd.s32 4294967280, %v740_v13 }
  0x1d   :  { %88 = vadd.xlane.f32.xlu0 %v87_v27 }
  0x24   :  { %103 = vadd.xlane.f32.xlu2 %v102_v34  ;;  %100 = vadd.xlane.f32.xlu1 %v99_v35  ;;  %v774_v34 = vadd.s32 4294967272, %v740_v13  ;;  %v778_v35 = vadd.s32 4294967288, %v740_v13 }
  0x25   :  { %97 = vadd.xlane.f32.xlu0 %v96_v36 }
  0x2c   :  { %112 = vadd.xlane.f32.xlu2 %v111_v43  ;;  %109 = vadd.xlane.f32.xlu1 %v108_v44 }
  0x2d   :  { %106 = vadd.xlane.f32.xlu0 %v105_v45 }
  0x35   :  { %115 = vadd.xlane.f32.xlu0 %v114_v48 }
  0x7f   :  { %v83_v50 = vpop.xlane.xlu2 %82  ;;  %v77_v51 = vpop.xlane.xlu1 %76 }
  0x80   :  { %v123_v52 = vadd.f32 %v723_v49, %v83_v50  ;;  %v121_v53 = vadd.f32 %v723_v49, %v77_v51  ;;  %v71_v54 = vpop.xlane.xlu0 %70 }
  0x81   :  { %v119_v55 = vadd.f32 %v723_v49, %v71_v54  ;;  %v803_v54 = vadd.s32 4294967240, %v740_v13 }
  0x82   :  { %v541_v56 = vmul.f32 -1.442695, %v123_v52  ;;  %v539_v57 = vmul.f32 -1.442695, %v121_v53  ;;  %v799_v52 = vadd.s32 4294967232, %v740_v13 }
  0x83   :  { %v537_v58 = vmul.f32 -1.442695, %v119_v55 }
  0x84   :  { %558 = vpow2.f32 %v541_v56 }
  0x85   :  { %560 = vpow2.f32 %v539_v57 }
  0x86   :  { %562 = vpow2.f32 %v537_v58 }
  0x87   :  { %v86_v59 = vpop.xlane.xlu2 %85  ;;  %v80_v60 = vpop.xlane.xlu1 %79 }
  0x88   :  { %v124_v61 = vadd.f32 %v723_v49, %v86_v59  ;;  %v122_v62 = vadd.f32 %v723_v49, %v80_v60  ;;  %v74_v63 = vpop.xlane.xlu0 %73 }
  0x89   :  { %v120_v0 = vadd.f32 %v723_v49, %v74_v63 }
  0x8a   :  { %v559_v1 = vpop.eup %558  ;;  %v542_v2 = vmul.f32 -1.442695, %v124_v61  ;;  %v540_v5 = vmul.f32 -1.442695, %v122_v62 }
  0x8b   :  { %v561_v3 = vpop.eup %560  ;;  %v731_v4 = vadd.f32 1.0, %v559_v1  ;;  %v538_v8 = vmul.f32 -1.442695, %v120_v0 }
  0x8c   :  { %v563_v6 = vpop.eup %562  ;;  %v733_v7 = vadd.f32 1.0, %v561_v3  ;;  %564 = vpow2.f32 %v542_v2 }
  0x8d   :  { %566 = vrcp.f32 %v731_v4  ;;  %v737_v10 = vadd.f32 1.0, %v563_v6  ;;  %v270_v28 = vand.u32 2147483648, %v731_v4  ;;  %vm264_vm1 = vweird.f32 %v731_v4 }
  0x8e   :  { %568 = vrcp.f32 %v733_v7  ;;  %v240_v29 = vand.u32 2147483648, %v733_v7  ;;  %v268_v36 = vand.u32 2147483647, %v731_v4  ;;  %vm234_vm2 = vweird.f32 %v733_v7 }
  0x8f   :  { %570 = vpow2.f32 %v540_v5  ;;  %v95_v11 = vpop.xlane.xlu2 %94  ;;  %v92_v32 = vpop.xlane.xlu1 %91  ;;  %v210_v38 = vand.u32 2147483648, %v737_v10  ;;  %v208_v41 = vand.u32 2147483647, %v737_v10  ;;  %v788_v44 = vor.u32 1.1754944e-38, %v270_v28 }
  0x90   :  { %572 = vpow2.f32 %v538_v8  ;;  %v127_v14 = vadd.f32 %v723_v49, %v95_v11  ;;  %v126_v42 = vadd.f32 %v723_v49, %v92_v32  ;;  %v89_v43 = vpop.xlane.xlu0 %88  ;;  %v238_v45 = vand.u32 2147483647, %v733_v7 }
  0x91   :  { %574 = vrcp.f32 %v737_v10  ;;  %v792_v46 = vor.u32 1.1754944e-38, %v240_v29  ;;  %vm204_vm3 = vweird.f32 %v737_v10  ;;  %v211_v53 = vor.u32 1.1754944e-38, %v210_v38 }
  0x92   :  { %v565_v12 = vpop.eup %564  ;;  %v545_v18 = vmul.f32 -1.442695, %v127_v14  ;;  %v125_v55 = vadd.f32 %v723_v49, %v89_v43  ;;  %vm809_vm4 = vcmp.eq.f32.partialorder %v208_v41, 8.507059e+37  ;;  %v544_v61 = vmul.f32 -1.442695, %v126_v42 }
  0x93   :  { %v743_v15 = vpop.eup %566  ;;  %v745_v16 = vadd.f32 1.0, %v565_v12  ;;  %vm835_vm10 = vcmp.eq.f32.partialorder %v268_v36, 8.507059e+37  ;;  %vm840_vm11 = vcmp.eq.f32.partialorder %v238_v45, 8.507059e+37 }
  0x94   :  { %v747_v17 = vpop.eup %568  ;;  %v260_v20 = vmul.f32 %v743_v15, %v731_v4  ;;  %vm265_vm5 = vweird.f32 %v743_v15  ;;  %v543_v9 = vmul.f32 -1.442695, %v125_v55 }
  0x95   :  { %v571_v19 = vpop.eup %570  ;;  %576 = vrcp.f32 %v745_v16  ;;  %v230_v26 = vmul.f32 %v747_v17, %v733_v7  ;;  %v285_v59 = vand.u32 2147483648, %v745_v16  ;;  %vm235_vm6 = vweird.f32 %v747_v17  ;;  %vm831_vm9 = vmor %vm264_vm1, %vm265_vm5 }
  0x96   :  { %v573_v21 = vpop.eup %572  ;;  %v755_v23 = vadd.f32 1.0, %v571_v19  ;;  %578 = vpow2.f32 %v545_v18  ;;  %v261_v33 = vsub.f32 1.0, %v260_v20  ;;  %vm279_vm8 = vweird.f32 %v745_v16  ;;  %vm870_vm15 = vmor %vm234_vm2, %vm235_vm6 }
  0x97   :  { %v757_v24 = vpop.eup %574  ;;  %v764_v27 = vadd.f32 1.0, %v573_v21  ;;  %v231_v40 = vsub.f32 1.0, %v230_v26  ;;  %v104_v3 = vpop.xlane.xlu2 %103  ;;  %v283_v5 = vand.u32 2147483647, %v745_v16  ;;  %v844_v19 = vor.u32 1.1754944e-38, %v285_v59 }
  0x98   :  { %v200_v30 = vmul.f32 %v757_v24, %v737_v10  ;;  %580 = vrcp.f32 %v755_v23  ;;  %v262_v48 = vmul.f32 %v743_v15, %v261_v33  ;;  %vm205_vm7 = vweird.f32 %v757_v24  ;;  %v98_v43 = vpop.xlane.xlu0 %97 }
  0x99   :  { %582 = vrcp.f32 %v764_v27  ;;  %v232_v57 = vmul.f32 %v747_v17, %v231_v40  ;;  %v223_v20 = vand.u32 2147483647, %v764_v27  ;;  %vm851_vm12 = vmor %vm204_vm3, %vm205_vm7  ;;  %vm249_vm13 = vweird.f32 %v755_v23 }
  0x9a   :  { %v201_v37 = vsub.f32 1.0, %v200_v30  ;;  %v263_v0 = vadd.f32 %v743_v15, %v262_v48  ;;  %v253_v21 = vand.u32 2147483647, %v755_v23  ;;  %vm219_vm14 = vweird.f32 %v764_v27 }
  0x9b   :  { %v783_v39 = vpop.eup %576  ;;  %v233_v14 = vadd.f32 %v747_v17, %v232_v57  ;;  %v225_v30 = vand.u32 2147483648, %v764_v27  ;;  %vm460_vm1 = vcmask 130112   ;;  %vm881_vm5 = vcmp.eq.f32.partialorder %v223_v20, 8.507059e+37 }
  0x9c   :  { %v579_v47 = vpop.eup %578  ;;  %v202_v50 = vmul.f32 %v757_v24, %v201_v37  ;;  %v275_v51 = vmul.f32 %v783_v39, %v745_v16  ;;  %v267_v28 = vsel %vm831_vm9, %v743_v15, %v263_v0  ;;  %vm280_vm0 = vweird.f32 %v783_v39 }
  0x9d   :  { %v814_v60 = vadd.f32 1.0, %v579_v47  ;;  %v237_v37 = vsel %vm870_vm15, %v747_v17, %v233_v14  ;;  %v130_v38 = vadd.f32 %v723_v49, %v104_v3  ;;  %vm888_vm2 = vcmp.eq.f32.partialorder %v283_v5, 8.507059e+37 }
  0x9e   :  { %v806_v56 = vpop.eup %580  ;;  %v203_v1 = vadd.f32 %v757_v24, %v202_v50  ;;  %v276_v2 = vsub.f32 1.0, %v275_v51  ;;  %vm464_vm7 = vcmask 195712   ;;  %v226_v48 = vor.u32 1.1754944e-38, %v225_v30 }
  0x9f   :  { %v245_v62 = vmul.f32 %v806_v56, %v755_v23  ;;  %v583_v63 = vpop.eup %582  ;;  %584 = vrcp.f32 %v814_v60  ;;  %vm250_vm6 = vweird.f32 %v806_v56  ;;  %v548_v50 = vmul.f32 -1.442695, %v130_v38  ;;  %v113_v0 = vpop.xlane.xlu2 %112 }
  0xa0   :  { %v215_v8 = vmul.f32 %v583_v63, %v764_v27  ;;  %586 = vpow2.f32 %v544_v61  ;;  %v207_v29 = vsel %vm851_vm12, %v757_v24, %v203_v1  ;;  %v277_v10 = vmul.f32 %v783_v39, %v276_v2  ;;  %v101_v24 = vpop.xlane.xlu1 %100  ;;  %vm921_vm12 = vmor %vm279_vm8, %vm280_vm0 }
  0xa1   :  { %v246_v6 = vsub.f32 1.0, %v245_v62  ;;  %vm220_vm3 = vweird.f32 %v583_v63  ;;  %588 = vpow2.f32 %v543_v9  ;;  %v212_v40 = vsel %vm809_vm4, %v211_v53, %v207_v29 }
  0xa2   :  { %v216_v26 = vsub.f32 1.0, %v215_v8  ;;  %v278_v47 = vadd.f32 %v783_v39, %v277_v10  ;;  %vm221_vm9 = vmor %vm219_vm14, %vm220_vm3  ;;  %v129_v51 = vadd.f32 %v723_v49, %v101_v24  ;;  %590 = vpow2.f32 %v548_v50  ;;  %v107_v24 = vpop.xlane.xlu0 %106 }
  0xa3   :  { %v247_v15 = vmul.f32 %v806_v56, %v246_v6  ;;  %v128_v62 = vadd.f32 %v723_v49, %v98_v43  ;;  %v909_v27 = vsel %vm835_vm10, %v788_v44, %v267_v28  ;;  %v255_v1 = vand.u32 2147483648, %v755_v23  ;;  %vm933_vm10 = vmor %vm249_vm13, %vm250_vm6 }
  0xa4   :  { %v217_v33 = vmul.f32 %v583_v63, %v216_v26  ;;  %v547_v61 = vmul.f32 -1.442695, %v129_v51  ;;  %vm468_vm4 = vcmask 261312   ;;  %v457_v3 = vperm.slane %v212_v40, %v740_v13 }
  0xa5   :  { %v876_v36 = vpop.eup %584  ;;  %v248_v53 = vadd.f32 %v806_v56, %v247_v15  ;;  %v282_v6 = vsel %vm921_vm12, %v783_v39, %v278_v47  ;;  %v328_v39 = vand.u32 2147483647, %v814_v60  ;;  %v330_v12 = vand.u32 2147483648, %v814_v60 }
  0xa6   :  { %v218_v42 = vadd.f32 %v583_v63, %v217_v33  ;;  %v320_v17 = vmul.f32 %v876_v36, %v814_v60  ;;  %v587_v45 = vpop.eup %586  ;;  %vm254_vm8 = vcmp.eq.f32.partialorder %v253_v21, 8.507059e+37  ;;  %v256_v14 = vor.u32 1.1754944e-38, %v255_v1 }
  0xa7   :  { %v901_v58 = vadd.f32 1.0, %v587_v45  ;;  %v589_v2 = vpop.eup %588  ;;  %v252_v11 = vsel %vm933_vm10, %v806_v56, %v248_v53  ;;  %v287_v20 = vsel %vm888_vm2, %v844_v19, %v282_v6  ;;  %vm325_vm13 = vweird.f32 %v876_v36 }
  0xa8   :  { %v222_v55 = vsel %vm221_vm9, %v583_v63, %v218_v42  ;;  %v321_v57 = vsub.f32 1.0, %v320_v17  ;;  %v242_v63 = vsel %vm840_vm11, %v792_v46, %v237_v37  ;;  %v546_v46 = vmul.f32 -1.442695, %v128_v62  ;;  %v591_v18 = vpop.eup %590  ;;  %v110_v32 = vpop.xlane.xlu1 %109 }
  0xa9   :  { %v227_v59 = vsel %vm881_vm5, %v226_v48, %v222_v55  ;;  %592 = vrcp.f32 %v901_v58  ;;  %v938_v9 = vadd.f32 1.0, %v589_v2  ;;  %v463_v23 = vperm.slane %v242_v63, %v760_v25 }
  0xaa   :  { %v459_v44 = vperm.slane %v227_v59, %v778_v35  ;;  %594 = vpow2.f32 %v547_v61  ;;  %v322_v16 = vmul.f32 %v876_v36, %v321_v57  ;;  %v133_v35 = vadd.f32 %v723_v49, %v113_v0 }
  0xab   :  { %596 = vpow2.f32 %v546_v46  ;;  %vm324_vm11 = vweird.f32 %v814_v60  ;;  %v257_v26 = vsel %vm254_vm8, %v256_v14, %v252_v11  ;;  %v957_v21 = vadd.f32 1.0, %v591_v18 }
  0xac   :  { %598 = vrcp.f32 %v938_v9  ;;  %v461_v4 = vsel %vm460_vm1, %v459_v44, %v457_v3  ;;  %v323_v25 = vadd.f32 %v876_v36, %v322_v16  ;;  %v551_v28 = vmul.f32 -1.442695, %v133_v35  ;;  %vm975_vm1 = vmor %vm324_vm11, %vm325_vm13 }
  0xad   :  { %v471_v10 = vperm.slane %v909_v27, %v753_v22  ;;  %vm961_vm14 = vcmp.eq.f32.partialorder %v328_v39, 8.507059e+37  ;;  %v331_v30 = vor.u32 1.1754944e-38, %v330_v12  ;;  %vm472_vm15 = vcmask 326912   ;;  %v116_v12 = vpop.xlane.xlu0 %115 }
  0xae   :  { %v465_v15 = vsel %vm464_vm7, %v463_v23, %v461_v4  ;;  %vm476_vm0 = vcmask 392512   ;;  %600 = vrcp.f32 %v957_v21  ;;  %v475_v7 = vperm.slane %v287_v20, %v771_v31 }
  0xaf   :  { %v954_v56 = vpop.eup %592  ;;  %v467_v22 = vperm.slane %v257_v26, %v774_v34  ;;  %602 = vpow2.f32 %v551_v28  ;;  %v327_v42 = vsel %vm975_vm1, %v876_v36, %v323_v25  ;;  %v315_v31 = vand.u32 2147483648, %v901_v58 }
  0xb0   :  { %v595_v29 = vpop.eup %594  ;;  %v305_v33 = vmul.f32 %v954_v56, %v901_v58  ;;  %v132_v17 = vadd.f32 %v723_v49, %v110_v32  ;;  %v992_v43 = vadd.s32 4294967248, %v740_v13  ;;  %v998_v48 = vadd.s32 4294967216, %v740_v13 }
  0xb1   :  { %v597_v37 = vpop.eup %596  ;;  %v979_v40 = vadd.f32 1.0, %v595_v29  ;;  %v469_v60 = vsel %vm468_vm4, %v467_v22, %v465_v15  ;;  %v1001_v36 = vadd.s32 4294967224, %v740_v13  ;;  %v1006_v50 = vsel %vm961_vm14, %v331_v30, %v327_v42 }
  0xb2   :  { %v981_v41 = vpop.eup %598  ;;  %v987_v34 = vadd.f32 1.0, %v597_v37  ;;  %v306_v47 = vsub.f32 1.0, %v305_v33  ;;  %vm309_vm3 = vweird.f32 %v901_v58  ;;  %v313_v51 = vand.u32 2147483647, %v901_v58 }
  0xb3   :  { %v290_v45 = vmul.f32 %v981_v41, %v938_v9  ;;  %604 = vrcp.f32 %v979_v40  ;;  %v1012_v57 = vor.u32 1.1754944e-38, %v315_v31  ;;  %v473_v59 = vsel %vm472_vm15, %v471_v10, %v469_v60 }
  0xb4   :  { %606 = vrcp.f32 %v987_v34  ;;  %v1010_v55 = vpop.eup %600  ;;  %vm294_vm5 = vweird.f32 %v938_v9  ;;  %v550_v61 = vmul.f32 -1.442695, %v132_v17  ;;  %v298_v27 = vand.u32 2147483647, %v938_v9 }
  0xb5   :  { %v291_v53 = vsub.f32 1.0, %v290_v45  ;;  %v603_v62 = vpop.eup %602  ;;  %v300_v63 = vand.u32 2147483648, %v938_v9  ;;  %v365_v1 = vmul.f32 %v1010_v55, %v957_v21  ;;  %v487_v2 = vperm.slane %v1006_v50, %v799_v52 }
  0xb6   :  { %v307_v3 = vmul.f32 %v954_v56, %v306_v47  ;;  %v1024_v5 = vadd.f32 1.0, %v603_v62  ;;  %v131_v44 = vadd.f32 %v723_v49, %v107_v24  ;;  %vm310_vm2 = vweird.f32 %v954_v56 }
  0xb7   :  { %v292_v0 = vmul.f32 %v981_v41, %v291_v53  ;;  %v1031_v6 = vsel %vm476_vm0, %v475_v7, %v473_v59  ;;  %vm295_vm6 = vweird.f32 %v981_v41  ;;  %608 = vpow2.f32 %v550_v61  ;;  %vm1073_vm8 = vmor %vm309_vm3, %vm310_vm2 }
  0xb8   :  { %vm1036_vm7 = vcmp.eq.f32.partialorder %v313_v51, 8.507059e+37  ;;  %v366_v11 = vsub.f32 1.0, %v365_v1  ;;  %610 = vrcp.f32 %v1024_v5  ;;  %vm1044_vm9 = vcmp.eq.f32.partialorder %v298_v27, 8.507059e+37  ;;  %vm1057_vm10 = vmor %vm294_vm5, %vm295_vm6 }
  0xb9   :  { %v1027_v46 = vpop.eup %604  ;;  %v293_v35 = vadd.f32 %v981_v41, %v292_v0  ;;  %v301_v14 = vor.u32 1.1754944e-38, %v300_v63  ;;  %vm369_vm4 = vweird.f32 %v957_v21  ;;  %v308_v20 = vadd.f32 %v954_v56, %v307_v3 }
  0xba   :  { %v1034_v8 = vpop.eup %606  ;;  %v350_v39 = vmul.f32 %v1027_v46, %v979_v40  ;;  %v373_v4 = vand.u32 2147483647, %v957_v21  ;;  %v549_v25 = vmul.f32 -1.442695, %v131_v44  ;;  %vm480_vm12 = vcmask 458112  }
  0xbb   :  { %v335_v18 = vmul.f32 %v1034_v8, %v987_v34  ;;  %v375_v29 = vand.u32 2147483648, %v957_v21  ;;  %v358_v10 = vand.u32 2147483647, %v979_v40  ;;  %v134_v30 = vadd.f32 %v723_v49, %v116_v12 }
  0xbc   :  { %v351_v26 = vsub.f32 1.0, %v350_v39  ;;  %v297_v32 = vsel %vm1057_vm10, %v981_v41, %v293_v35  ;;  %v367_v15 = vmul.f32 %v1010_v55, %v366_v11  ;;  %612 = vpow2.f32 %v549_v25 }
  0xbd   :  { %v336_v19 = vsub.f32 1.0, %v335_v18  ;;  %v609_v9 = vpop.eup %608  ;;  %vm354_vm11 = vweird.f32 %v979_v40  ;;  %v360_v49 = vand.u32 2147483648, %v979_v40  ;;  %v343_v37 = vand.u32 2147483647, %v987_v34 }
  0xbe   :  { %v352_v33 = vmul.f32 %v1027_v46, %v351_v26  ;;  %v552_v7 = vmul.f32 -1.442695, %v134_v30  ;;  %v1080_v22 = vpop.eup %610  ;;  %v312_v38 = vsel %vm1073_vm8, %v954_v56, %v308_v20  ;;  %vm1085_vm13 = vcmp.eq.f32.partialorder %v373_v4, 8.507059e+37 }
  0xbf   :  { %v337_v58 = vmul.f32 %v1034_v8, %v336_v19  ;;  %v345_v42 = vand.u32 2147483648, %v987_v34  ;;  %v1091_v31 = vadd.f32 1.0, %v609_v9  ;;  %v302_v17 = vsel %vm1044_vm9, %v301_v14, %v297_v32 }
  0xc0   :  { %vm370_vm14 = vweird.f32 %v1010_v55  ;;  %v410_v60 = vmul.f32 %v1080_v22, %v1024_v5  ;;  %614 = vpow2.f32 %v552_v7  ;;  %v368_v56 = vadd.f32 %v1010_v55, %v367_v15 }
  0xc1   :  { %v353_v45 = vadd.f32 %v1027_v46, %v352_v33  ;;  %vm355_vm15 = vweird.f32 %v1027_v46  ;;  %616 = vrcp.f32 %v1091_v31  ;;  %v317_v47 = vsel %vm1036_vm7, %v1012_v57, %v312_v38  ;;  %vm1110_vm1 = vmor %vm369_vm4, %vm370_vm14 }
  0xc2   :  { %v376_v51 = vor.u32 1.1754944e-38, %v375_v29  ;;  %vm339_vm0 = vweird.f32 %v987_v34  ;;  %v420_v53 = vand.u32 2147483648, %v1024_v5  ;;  %v613_v59 = vpop.eup %612  ;;  %v479_v61 = vperm.slane %v302_v17, %v992_v43  ;;  %vm1118_vm5 = vmor %vm354_vm11, %vm355_vm15 }
  0xc3   :  { %v338_v0 = vadd.f32 %v1034_v8, %v337_v58  ;;  %vm340_vm3 = vweird.f32 %v1034_v8  ;;  %v411_v27 = vsub.f32 1.0, %v410_v60  ;;  %vm1122_vm2 = vcmp.eq.f32.partialorder %v358_v10, 8.507059e+37 }
  0xc4   :  { %v361_v21 = vor.u32 1.1754944e-38, %v360_v49  ;;  %vm1126_vm6 = vcmp.eq.f32.partialorder %v343_v37, 8.507059e+37  ;;  %v1130_v1 = vadd.f32 1.0, %v613_v59  ;;  %v372_v3 = vsel %vm1110_vm1, %v1010_v55, %v368_v56  ;;  %vm1142_vm7 = vmor %vm339_vm0, %vm340_vm3 }
  0xc5   :  { %v357_v40 = vsel %vm1118_vm5, %v1027_v46, %v353_v45  ;;  %v346_v44 = vor.u32 1.1754944e-38, %v345_v42  ;;  %v418_v16 = vand.u32 2147483647, %v1024_v5  ;;  %v483_v11 = vperm.slane %v317_v47, %v803_v54 }
  0xc6   :  { %v615_v35 = vpop.eup %614  ;;  %vm414_vm9 = vweird.f32 %v1024_v5  ;;  %v421_v12 = vor.u32 1.1754944e-38, %v420_v53  ;;  %618 = vrcp.f32 %v1130_v1  ;;  %v481_v46 = vsel %vm480_vm12, %v479_v61, %v1031_v6 }
  0xc7   :  { %v617_v55 = vpop.eup %616  ;;  %v342_v23 = vsel %vm1142_vm7, %v1034_v8, %v338_v0  ;;  %v412_v54 = vmul.f32 %v1080_v22, %v411_v27  ;;  %v1154_v34 = vadd.f32 1.0, %v615_v35  ;;  %v1158_v14 = vsel %vm1085_vm13, %v376_v51, %v372_v3 }
  0xc8   :  { %v362_v18 = vsel %vm1122_vm2, %v361_v21, %v357_v40  ;;  %v395_v20 = vmul.f32 %v617_v55, %v1091_v31  ;;  %vm484_vm4 = vcmask 523712   ;;  %v403_v6 = vand.u32 2147483647, %v1091_v31 }
  0xc9   :  { %v405_v4 = vand.u32 2147483648, %v1091_v31  ;;  %620 = vrcp.f32 %v1154_v34  ;;  %vm1166_vm12 = vcmp.eq.f32.partialorder %v418_v16, 8.507059e+37  ;;  %v347_v26 = vsel %vm1126_vm6, %v346_v44, %v342_v23 }
  0xca   :  { %v396_v25 = vsub.f32 1.0, %v395_v20  ;;  %vm399_vm10 = vweird.f32 %v1091_v31  ;;  %vm415_vm8 = vweird.f32 %v1080_v22  ;;  %v495_v28 = vperm.slane %v362_v18, %v998_v48 }
  0xcb   :  { %v413_v29 = vadd.f32 %v1080_v22, %v412_v54  ;;  %v485_v10 = vsel %vm484_vm4, %v483_v11, %v481_v46  ;;  %vm488_vm11 = vcmask 589312   ;;  %vm400_vm13 = vweird.f32 %v617_v55  ;;  %vm1189_vm0 = vmor %vm414_vm9, %vm415_vm8 }
  0xcc   :  { %v619_v19 = vpop.eup %618  ;;  %v397_v30 = vmul.f32 %v617_v55, %v396_v25  ;;  %v388_v32 = vand.u32 2147483647, %v1130_v1  ;;  %v390_v15 = vand.u32 2147483648, %v1130_v1  ;;  %v491_v33 = vperm.slane %v347_v26, %v1001_v36  ;;  %vm1195_vm5 = vmor %vm399_vm10, %vm400_vm13 }
  0xcd   :  { %vm1179_vm14 = vcmp.eq.f32.partialorder %v403_v6, 8.507059e+37  ;;  %v406_v24 = vor.u32 1.1754944e-38, %v405_v4  ;;  %v380_v48 = vmul.f32 %v619_v19, %v1130_v1  ;;  %vm384_vm15 = vweird.f32 %v1130_v1 }
  0xce   :  { %v398_v49 = vadd.f32 %v617_v55, %v397_v30  ;;  %vm492_vm1 = vcmask 654912   ;;  %vm496_vm3 = vcmask 720512   ;;  %v417_v41 = vsel %vm1189_vm0, %v1080_v22, %v413_v29 }
  0xcf   :  { %v621_v36 = vpop.eup %620  ;;  %v381_v38 = vsub.f32 1.0, %v380_v48  ;;  %v489_v5 = vsel %vm488_vm11, %v487_v2, %v485_v10  ;;  %v498_v58 = vadd.s32 4294967208, %v740_v13  ;;  %vm1207_vm2 = vcmp.eq.f32.partialorder %v388_v32, 8.507059e+37 }
  0xd0   :  { %v391_v31 = vor.u32 1.1754944e-38, %v390_v15  ;;  %v425_v17 = vmul.f32 %v621_v36, %v1154_v34  ;;  %v402_v60 = vsel %vm1195_vm5, %v617_v55, %v398_v49  ;;  %vm385_vm6 = vweird.f32 %v619_v19 }
  0xd1   :  { %v382_v56 = vmul.f32 %v619_v19, %v381_v38  ;;  %vm429_vm7 = vweird.f32 %v1154_v34  ;;  %v493_v22 = vsel %vm492_vm1, %v491_v33, %v489_v5  ;;  %v422_v50 = vsel %vm1166_vm12, %v421_v12, %v417_v41  ;;  %vm386_vm9 = vmor %vm384_vm15, %vm385_vm6 }
  0xd2   :  { %v426_v52 = vsub.f32 1.0, %v425_v17  ;;  %v433_v2 = vand.u32 2147483647, %v1154_v34  ;;  %v506_v45 = vadd.s32 4294967192, %v740_v13  ;;  %v407_v51 = vsel %vm1179_vm14, %v406_v24, %v402_v60 }
  0xd3   :  { %v383_v47 = vadd.f32 %v619_v19, %v382_v56  ;;  %v435_v53 = vand.u32 2147483648, %v1154_v34  ;;  %v502_v59 = vadd.s32 4294967200, %v740_v13  ;;  %vm430_vm4 = vweird.f32 %v621_v36 }
  0xd4   :  { %v427_v61 = vmul.f32 %v621_v36, %v426_v52  ;;  %v497_v62 = vsel %vm496_vm3, %v495_v28, %v493_v22  ;;  %v499_v0 = vperm.slane %v1158_v14, %v498_v58  ;;  %vm500_vm12 = vcmask 786112   ;;  %vm431_vm8 = vmor %vm429_vm7, %vm430_vm4 }
  0xd5   :  { %v387_v27 = vsel %vm386_vm9, %v619_v19, %v383_v47  ;;  %vm504_vm10 = vcmask 851712   ;;  %v510_v57 = vadd.s32 4294967184, %v740_v13  ;;  %v507_v43 = vperm.slane %v407_v51, %v506_v45 }
  0xd6   :  { %v392_v63 = vsel %vm1207_vm2, %v391_v31, %v387_v27  ;;  %v428_v21 = vadd.f32 %v621_v36, %v427_v61  ;;  %v514_v3 = vadd.s32 4294967176, %v740_v13  ;;  %v436_v1 = vor.u32 1.1754944e-38, %v435_v53 }
  0xd7   :  { %v503_v40 = vperm.slane %v392_v63, %v502_v59  ;;  %vm508_vm11 = vcmask 917312   ;;  %vm434_vm13 = vcmp.eq.f32.partialorder %v433_v2, 8.507059e+37  ;;  %v501_v16 = vsel %vm500_vm12, %v499_v0, %v497_v62 }
  0xd8   :  { %v432_v44 = vsel %vm431_vm8, %v621_v36, %v428_v21  ;;  %vm512_vm14 = vcmask 982912   ;;  %v511_v13 = vperm.slane %v422_v50, %v510_v57  ;;  %vm516_vm15 = vcmask 1048512  }
  0xd9   :  { %v437_v35 = vsel %vm434_vm13, %v436_v1, %v432_v44  ;;  %v505_v11 = vsel %vm504_vm10, %v503_v40, %v501_v16 }
  0xda   :  { %v509_v39 = vsel %vm508_vm11, %v507_v43, %v505_v11  ;;  %v515_v12 = vperm.slane %v437_v35, %v514_v3 }
  0xdb   :  { %v513_v55 = vsel %vm512_vm14, %v511_v13, %v509_v39 }
  0xdc   :  { %v517_v46 = vsel %vm516_vm15, %v515_v12, %v513_v55 }
  0xdd   :  { %519 = vst [vmem:[#allocation6] sm:$0x1] %v517_v46 }
  0xde   :  { %530 = dma.vmem_to_hbm [thread:$0]  %s526_s21, 16, %s528_s24, [#allocation5]  }
  0xdf   :  { %672 = dma.done.wait [#allocation5], 16  }
  0xe0   :  { %673 = vsyncadd [#allocation5], 4294967280 }
  0xe1   :  { %535 = vsyncpa [#allocation4], 1 }
  0xe2   :  { %536 = vsyncpa [#allocation5], 1 }

</bundles_post_ra>
